<compile_context>
chip_gen: v7x
topology: tpu7x:2x2x1
jax: 0.10.0
libtpu: 0.0.40
codegen_flags: <defaults>
</compile_context>

<pallas_src>
import jax
import jax.numpy as jnp
from jax.experimental import pallas as pl
from jax.experimental.pallas import tpu as pltpu


def _molclip_logits_kernel(mol_ref, wm_ref, bm_ref, xn_ref, logits_ref):
    # mol_ref    : (TB, Dm)   bf16/f32  molecule-embedding row tile (pipelined)
    # wm_ref     : (Dm, d)    bf16/f32  mol2latent weight (x @ W layout), grid-resident
    # bm_ref     : (1, d)     f32       mol2latent bias, grid-resident
    # xn_ref     : (1, d)     f32       pre-normalized text latent, grid-resident
    # logits_ref : (1, 1, TB) f32       lane-dense logits slab for this tile

    # Linear projection on the MXU with f32 accumulation; bias add on the VPU.
    mol_lat = jnp.dot(mol_ref[...], wm_ref[...],
                      preferred_element_type=jnp.float32) + bm_ref[...]      # (TB, d)

    # Row-wise L2 normalize.  rsqrt lowers to the EUP (its own VLIW slot); the
    # clamp on sumsq matches F.normalize's x / max(||x||, 1e-12) exactly, since
    # max(s, 1e-24) == max(sqrt(s), 1e-12)^2.
    sumsq = jnp.sum(mol_lat * mol_lat, axis=-1, keepdims=True)               # (TB, 1)
    y_n = mol_lat * jax.lax.rsqrt(jnp.maximum(sumsq, 1e-24))                 # (TB, d)

    # logits[t] = <Xn, Yn[t]> as an MXU contraction -> lane-dense (1, TB).
    logits = jax.lax.dot_general(
        xn_ref[...], y_n,
        dimension_numbers=(((1,), (1,)), ((), ())),
        preferred_element_type=jnp.float32)                                  # (1, TB)
    logits_ref[...] = logits.reshape(logits_ref.shape)


def _round_up(x, m):
    return ((x + m - 1) // m) * m


def _choose_tile_rows(batch, feature_dim, itemsize):
    """Largest 128-aligned row tile whose double-buffered mol_emb stream stays
    comfortably inside the default scoped VMEM budget on every chip
    (16 MiB v5e, 32 MiB v6e/v7x; v7x has only 64 MiB physical)."""
    budget_bytes = 4 * 1024 * 1024           # 2 pipeline buffers => <= 8 MiB total
    tb = budget_bytes // (2 * feature_dim * itemsize)
    tb = max(128, min(2048, (tb // 128) * 128))
    # No point tiling past the (128-padded) batch itself.
    return min(tb, _round_up(batch, 128))


def molclip_forward(mol_emb, wm, bm, txt_pool, wt, bt,
                    *, use_bf16=True, tile_rows=None):
    """MolCLIP do_CL_eval hot path. Returns logits of shape (B,) in f32."""
    B, Dm = mol_emb.shape
    d = wm.shape[1]

    # ---- text path: batch-1 and loop-invariant -> hoisted out of the kernel ----
    txt_lat = jnp.dot(txt_pool.astype(jnp.float32), wt.astype(jnp.float32),
                      preferred_element_type=jnp.float32) + bt.astype(jnp.float32)
    xn = txt_lat * jax.lax.rsqrt(
        jnp.maximum(jnp.sum(txt_lat * txt_lat, axis=-1, keepdims=True), 1e-24))
    xn = xn.astype(jnp.float32)                                              # (1, d)

    # ---- molecule path: gridded Pallas kernel over the batch ----
    mxu_dtype = jnp.bfloat16 if use_bf16 else jnp.float32
    mol_in = mol_emb.astype(mxu_dtype)
    wm_in = wm.astype(mxu_dtype)
    bm_in = bm.astype(jnp.float32)

    tb = tile_rows or _choose_tile_rows(B, Dm, jnp.dtype(mxu_dtype).itemsize)
    num_tiles = pl.cdiv(B, tb)
    padded_b = num_tiles * tb
    if padded_b != B:
        # Zero-padded rows give harmless finite logits (clamped rsqrt); trimmed below.
        mol_in = jnp.pad(mol_in, ((0, padded_b - B), (0, 0)))

    out = pl.pallas_call(
        _molclip_logits_kernel,
        out_shape=jax.ShapeDtypeStruct((num_tiles, 1, tb), jnp.float32),
        grid=(num_tiles,),
        in_specs=[
            pl.BlockSpec((tb, Dm), lambda i: (i, 0)),   # mol_emb row tile (pipelined)
            pl.BlockSpec((Dm, d), lambda i: (0, 0)),    # wm (resident across grid)
            pl.BlockSpec((1, d), lambda i: (0, 0)),     # bm (resident)
            pl.BlockSpec((1, d), lambda i: (0, 0)),     # normalized text latent (resident)
        ],
        out_specs=pl.BlockSpec((1, 1, tb), lambda i: (i, 0, 0)),
        compiler_params=pltpu.CompilerParams(
            dimension_semantics=("parallel",)),
    )(mol_in, wm_in, bm_in, xn)

    return out.reshape(padded_b)[:B]


def _reference_forward_f32(mol_emb, wm, bm, txt_pool, wt, bt):
    """Plain-JAX f32 reference matching the PyTorch module semantics exactly."""
    mol_lat = mol_emb @ wm + bm
    txt_lat = txt_pool @ wt + bt

    def l2n(x):
        n = jnp.sqrt(jnp.sum(x * x, axis=-1, keepdims=True))
        return x / jnp.maximum(n, 1e-12)

    return jnp.sum(l2n(txt_lat) * l2n(mol_lat), axis=1)


def _reference_forward_matched(mol_emb, wm, bm, txt_pool, wt, bt, use_bf16=True):
    """Plain-JAX reference using the kernel's precision choices (bf16 MXU
    operands on the molecule stream, f32 accumulate, rsqrt-with-clamp)."""
    dt = jnp.bfloat16 if use_bf16 else jnp.float32
    mol_lat = jnp.dot(mol_emb.astype(dt), wm.astype(dt),
                      preferred_element_type=jnp.float32) + bm
    txt_lat = jnp.dot(txt_pool.astype(jnp.float32), wt.astype(jnp.float32),
                      preferred_element_type=jnp.float32) + bt

    def l2n(x):
        s = jnp.sum(x * x, axis=-1, keepdims=True)
        return x * jax.lax.rsqrt(jnp.maximum(s, 1e-24))

    return jnp.sum(l2n(txt_lat) * l2n(mol_lat), axis=1)


if __name__ == "__main__":
    key = jax.random.PRNGKey(0)
    k1, k2, k3, k4, k5, k6 = jax.random.split(key, 6)

    # Small shapes consistent with the module:
    #   B molecules, MegaMolBART molecule_dim Dm, SciBERT text_dim Dt,
    #   SSL_emb_dim d (=256 in the module's defaults).
    B, Dm, Dt, d = 16, 256, 768, 256

    # Deterministic stand-ins for the frozen encoder outputs.
    mol_emb = jax.random.normal(k1, (B, Dm), dtype=jnp.float32)
    txt_pool = jax.random.normal(k2, (1, Dt), dtype=jnp.float32)

    # Deterministic mol2latent / text2latent linear parameters (x @ W layout).
    wm = jax.random.normal(k3, (Dm, d), dtype=jnp.float32) * 0.05
    bm = jax.random.normal(k4, (1, d), dtype=jnp.float32) * 0.01
    wt = jax.random.normal(k5, (Dt, d), dtype=jnp.float32) * 0.05
    bt = jax.random.normal(k6, (1, d), dtype=jnp.float32) * 0.01

    logits = molclip_forward(mol_emb, wm, bm, txt_pool, wt, bt)
    jax.block_until_ready(logits)
    assert logits.shape == (B,)

    # Tight check against a plain-JAX reference with the same precision choices
    # as the kernel (bf16 MXU operands, f32 accumulation, rsqrt normalize).
    ref_matched = _reference_forward_matched(mol_emb, wm, bm, txt_pool, wt, bt)
    assert jnp.allclose(logits, ref_matched, atol=2e-3, rtol=0.0), (
        float(jnp.max(jnp.abs(logits - ref_matched))))

    # Loose check against exact f32 PyTorch semantics (bf16 cast on the mol
    # stream costs ~1e-2 absolute on unit-norm cosine logits).
    ref_f32 = _reference_forward_f32(mol_emb, wm, bm, txt_pool, wt, bt)
    assert jnp.allclose(logits, ref_f32, atol=5e-2, rtol=0.0), (
        float(jnp.max(jnp.abs(logits - ref_f32))))

    print("KERNEL_OK")
</pallas_src>

<mosaic_0001>
module attributes {stable_mosaic.version = 11 : i64} {
  func.func @_molclip_logits_kernel(%arg0: i32, %arg1: memref<128x256xbf16, #tpu.memory_space<vmem>>, %arg2: memref<256x256xbf16, #tpu.memory_space<vmem>>, %arg3: memref<1x256xf32, #tpu.memory_space<vmem>>, %arg4: memref<1x256xf32, #tpu.memory_space<vmem>>, %arg5: memref<1x1x128xf32, #tpu.memory_space<vmem>>) attributes {dimension_semantics = [#tpu.dimension_semantics<parallel>], iteration_bounds = array<i64: 1>, scalar_prefetch = 0 : i64, scratch_operands = 0 : i64, tpu.core_type = #tpu.core_type<tc>, window_params = [{transform_indices = @transform_0, window_bounds = array<i64: 128, 256>}, {pipeline_mode = #tpu.pipeline_mode<synchronous>, transform_indices = @transform_1, window_bounds = array<i64: 256, 256>}, {pipeline_mode = #tpu.pipeline_mode<synchronous>, transform_indices = @transform_2, window_bounds = array<i64: 1, 256>}, {pipeline_mode = #tpu.pipeline_mode<synchronous>, transform_indices = @transform_3, window_bounds = array<i64: 1, 256>}, {transform_indices = @transform_4, window_bounds = array<i64: 1, 1, 128>}]} {
    %c0 = arith.constant 0 : index
    %c0_0 = arith.constant 0 : index
    %0 = vector.load %arg1[%c0, %c0_0] : memref<128x256xbf16, #tpu.memory_space<vmem>>, vector<128x256xbf16>
    %c0_1 = arith.constant 0 : index
    %c0_2 = arith.constant 0 : index
    %1 = vector.load %arg2[%c0_1, %c0_2] : memref<256x256xbf16, #tpu.memory_space<vmem>>, vector<256x256xbf16>
    %cst = arith.constant dense<0.000000e+00> : vector<128x256xf32>
    %2 = tpu.matmul %0, %1, %cst {dimension_numbers = #tpu.dot_dimension_numbers<[1], [0], [0], [1], [0, 0, 1, 1], [], []>} : vector<128x256xbf16>, vector<256x256xbf16>, vector<128x256xf32> -> vector<128x256xf32>
    %c0_3 = arith.constant 0 : index
    %c0_4 = arith.constant 0 : index
    %3 = vector.load %arg3[%c0_3, %c0_4] : memref<1x256xf32, #tpu.memory_space<vmem>>, vector<1x256xf32>
    %4 = vector.broadcast %3 : vector<1x256xf32> to vector<128x256xf32>
    %5 = arith.addf %2, %4 : vector<128x256xf32>
    %6 = arith.mulf %5, %5 : vector<128x256xf32>
    %cst_5 = arith.constant dense<0.000000e+00> : vector<128xf32>
    %7 = vector.multi_reduction <add>, %6, %cst_5 [1] : vector<128x256xf32> to vector<128xf32>
    %8 = vector.shape_cast %7 : vector<128xf32> to vector<128x1xf32>
    %cst_6 = arith.constant 1.000000e-24 : f32
    %9 = vector.broadcast %cst_6 : f32 to vector<128x1xf32>
    %10 = arith.maximumf %8, %9 : vector<128x1xf32>
    %11 = math.rsqrt %10 : vector<128x1xf32>
    %12 = vector.broadcast %11 : vector<128x1xf32> to vector<128x256xf32>
    %13 = arith.mulf %5, %12 : vector<128x256xf32>
    %c0_7 = arith.constant 0 : index
    %c0_8 = arith.constant 0 : index
    %14 = vector.load %arg4[%c0_7, %c0_8] : memref<1x256xf32, #tpu.memory_space<vmem>>, vector<1x256xf32>
    %cst_9 = arith.constant dense<0.000000e+00> : vector<1x128xf32>
    %15 = tpu.matmul %14, %13, %cst_9 {dimension_numbers = #tpu.dot_dimension_numbers<[1], [1], [0], [0], [0, 0, 1, 0], [], []>} : vector<1x256xf32>, vector<128x256xf32>, vector<1x128xf32> -> vector<1x128xf32>
    %16 = vector.shape_cast %15 : vector<1x128xf32> to vector<1x1x128xf32>
    %c0_10 = arith.constant 0 : index
    %c0_11 = arith.constant 0 : index
    %c0_12 = arith.constant 0 : index
    %17 = vector.load %arg5[%c0_10, %c0_11, %c0_12] : memref<1x1x128xf32, #tpu.memory_space<vmem>>, vector<1x1x128xf32>
    tpu.vector_store %arg5[%c0_10, %c0_11, %c0_12], %16 {strides = array<i32>} : memref<1x1x128xf32, #tpu.memory_space<vmem>>, vector<1x1x128xf32>,
    return
  }
  func.func @transform_0(%arg0: i32) -> (i32, i32) {
    %c0_i32 = arith.constant 0 : i32
    %c0_i32_0 = arith.constant 0 : i32
    return %arg0, %c0_i32 : i32, i32
  }
  func.func @transform_1(%arg0: i32) -> (i32, i32) {
    %c0_i32 = arith.constant 0 : i32
    %c0_i32_0 = arith.constant 0 : i32
    %c0_i32_1 = arith.constant 0 : i32
    return %c0_i32, %c0_i32_0 : i32, i32
  }
  func.func @transform_2(%arg0: i32) -> (i32, i32) {
    %c0_i32 = arith.constant 0 : i32
    %c0_i32_0 = arith.constant 0 : i32
    %c0_i32_1 = arith.constant 0 : i32
    return %c0_i32, %c0_i32_0 : i32, i32
  }
  func.func @transform_3(%arg0: i32) -> (i32, i32) {
    %c0_i32 = arith.constant 0 : i32
    %c0_i32_0 = arith.constant 0 : i32
    %c0_i32_1 = arith.constant 0 : i32
    return %c0_i32, %c0_i32_0 : i32, i32
  }
  func.func @transform_4(%arg0: i32) -> (i32, i32, i32) {
    %c0_i32 = arith.constant 0 : i32
    %c0_i32_0 = arith.constant 0 : i32
    %c0_i32_1 = arith.constant 0 : i32
    return %arg0, %c0_i32, %c0_i32_0 : i32, i32, i32
  }
}

</mosaic_0001>

<bundles_post_ra>
// kernel: tpu_custom_call.1
= control target key start
LH: loop header
LB: loop body
LE: loop exit
PB: predicated region body
PF: predicated region fallthrough
CT: control target
= control target key end

     0   :  { %9 = vsyncpa [#allocation3], 0  ;;  %s1247_s0 = inlined_call_operand.hbm [shape: bf16[128,256], index: 0, kind: input, shape index: {}]   ;;  %s1248_s1 = inlined_call_operand.hbm [shape: bf16[256,256], index: 1, kind: input, shape index: {}]   ;;  %s1249_s2 = inlined_call_operand.vmem [shape: f32[1,256], index: 2, kind: input, shape index: {}]   ;;  %s1250_s3 = inlined_call_operand.vmem [shape: f32[1,256], index: 3, kind: input, shape index: {}]   ;;  %s1251_s4 = inlined_call_operand.hbm [shape: f32[1,1,128], index: 4, kind: output, shape index: {}]  }
   0x1   :  { %10 = vsyncpa [#allocation6], 0 }
   0x2   :  { %11 = vsyncpa [#allocation4], 0  ;;  %s963_s15 = smov [#allocation2]   ;;  %s891_s19 = scalar_lea.hbm %s1247_s0, 2048 }
   0x3   :  { %s17_s16 = sshll.u32 %s963_s15, 4  ;;  %p892_p0 = scmp.ne.s32.totalorder %s1247_s0, %s891_s19  ;;  %s18_s16 = int_to_ptr.vmem [resolvable:$true] %s17_s16 }
   0x4   :  { %p895_p1 = scmp.lt.u32.totalorder %s891_s19, %s1247_s0 }
   0x6   :  { %p897_p2 = pnand %p895_p1, %p892_p0 }
   0x8   :  { %900 = shalt.err (!%p897_p2)
}
   0x9   :  { %s901_s24 = scalar_lea.vmem %s18_s16, 2048  ;;  %p906_p4 = scmp.lt.s32.totalorder %s18_s16, %s18_s16 }
   0xa   :  { %p902_p3 = scmp.ne.s32.totalorder %s18_s16, %s901_s24  ;;  %p907_p5 = scmp.lt.s32.totalorder %s901_s24, %s901_s24 }
   0xc   :  { %p908_p6 = por %p907_p5, %p906_p4 }
   0xe   :  { %p909_p7 = pnand %p908_p6, %p902_p3 }
  0x10   :  { %912 = shalt.err (!%p909_p7)
}
  0x11   :  { %s964_s25 = smov 128   ;;  %s965_s26 = smov 8  }
  0x12   :  { %23 = dma.hbm_to_vmem [thread:$0]  %s1247_s0, 2048, %s18_s16, [#allocation3], %s964_s25, %s964_s25, %s965_s26  }
  0x13   :  { %s966_s29 = smov [#allocation5]   ;;  %s913_s7 = scalar_lea.hbm %s1248_s1, 4096 }
  0x14   :  { %s29_s30 = sshll.u32 %s966_s29, 4  ;;  %p914_p8 = scmp.ne.s32.totalorder %s1248_s1, %s913_s7  ;;  %s30_s30 = int_to_ptr.vmem [resolvable:$true] %s29_s30 }
  0x15   :  { %p917_p9 = scmp.lt.u32.totalorder %s913_s7, %s1248_s1 }
  0x17   :  { %p919_p10 = pnand %p917_p9, %p914_p8 }
  0x19   :  { %922 = shalt.err (!%p919_p10)
}
  0x1a   :  { %s923_s12 = scalar_lea.vmem %s30_s30, 4096  ;;  %p928_p12 = scmp.lt.s32.totalorder %s30_s30, %s30_s30 }
  0x1b   :  { %p924_p11 = scmp.ne.s32.totalorder %s30_s30, %s923_s12  ;;  %p929_p13 = scmp.lt.s32.totalorder %s923_s12, %s923_s12 }
  0x1d   :  { %p930_p0 = por %p929_p13, %p928_p12 }
  0x1f   :  { %p931_p1 = pnand %p930_p0, %p924_p11 }
  0x21   :  { %934 = shalt.err (!%p931_p1)
}
  0x22   :  { %35 = dma.hbm_to_vmem [thread:$0]  %s1248_s1, 4096, %s30_s30, [#allocation6], %s964_s25, %s964_s25, %s965_s26  }
  0x23   :  { %957 = dma.done.wait [#allocation3], 2048  }
  0x24   :  { %958 = vsyncadd [#allocation3], 4294965248 }
  0x25   :  { %959 = dma.done.wait [#allocation6], 4096  }
  0x26   :  { %960 = vsyncadd [#allocation6], 4294963200  ;;  %v787_v0 = vld [vmem:[#allocation5 + $0x4] ss:$8 sps:$4 sm:$0xff]   ;;  %v789_v1 = vld [vmem:[#allocation5] ss:$8 sps:$4 sm:$0xff]   ;;  %v96_v48 = vlaneseq }
  0x27   :  { %346 = vmatprep.subr.bf16.mxu0 %v787_v0  ;;  %v790_v2 = vld [vmem:[#allocation5 + $0x14] ss:$8 sps:$4 sm:$0xff]   ;;  %v792_v3 = vld [vmem:[#allocation5 + $0x10] ss:$8 sps:$4 sm:$0xff]   ;;  %v793_v4 = vld [vmem:[#allocation5 + $0x24] ss:$8 sps:$4 sm:$0xff]  }
  0x28   :  { %347 = vmatpush1.bf16.msra.mxu0 %v789_v1  ;;  %v795_v5 = vld [vmem:[#allocation5 + $0x20] ss:$8 sps:$4 sm:$0xff]   ;;  %v796_v6 = vld [vmem:[#allocation5 + $0x34] ss:$8 sps:$4 sm:$0xff]   ;;  %v798_v7 = vld [vmem:[#allocation5 + $0x30] ss:$8 sps:$4 sm:$0xff]  }
  0x29   :  { %348 = vmatprep.subr.bf16.mxu0 %v790_v2  ;;  %v799_v8 = vld [vmem:[#allocation5 + $0x44] ss:$8 sps:$4 sm:$0xff]   ;;  %v801_v9 = vld [vmem:[#allocation5 + $0x40] ss:$8 sps:$4 sm:$0xff]   ;;  %v802_v10 = vld [vmem:[#allocation5 + $0x54] ss:$8 sps:$4 sm:$0xff]  }
  0x2a   :  { %v804_v11 = vld [vmem:[#allocation5 + $0x50] ss:$8 sps:$4 sm:$0xff]   ;;  %v805_v12 = vld [vmem:[#allocation5 + $0x64] ss:$8 sps:$4 sm:$0xff]   ;;  %v807_v14 = vld [vmem:[#allocation5 + $0x60] ss:$8 sps:$4 sm:$0xff]  }
  0x2b   :  { %v837_v13 = vld [vmem:[#allocation2 + $0x4] ss:$8 sps:$4 sm:$0xff]   ;;  %v808_v15 = vld [vmem:[#allocation5 + $0x74] ss:$8 sps:$4 sm:$0xff]   ;;  %v810_v16 = vld [vmem:[#allocation5 + $0x70] ss:$8 sps:$4 sm:$0xff]  }
  0x2c   :  { %349 = vmatpush1.bf16.msra.mxu0 %v792_v3  ;;  %378 = vmatprep.mubr.bf16.mxu0 %v837_v13  ;;  %v811_v17 = vld [vmem:[#allocation5 + $0x84] ss:$8 sps:$4 sm:$0xff]   ;;  %v813_v18 = vld [vmem:[#allocation5 + $0x80] ss:$8 sps:$4 sm:$0xff]   ;;  %v814_v19 = vld [vmem:[#allocation5 + $0x94] ss:$8 sps:$4 sm:$0xff]  }
  0x2d   :  { %350 = vmatprep.subr.bf16.mxu0 %v793_v4  ;;  %v816_v20 = vld [vmem:[#allocation5 + $0x90] ss:$8 sps:$4 sm:$0xff]   ;;  %v817_v21 = vld [vmem:[#allocation5 + $0xa4] ss:$8 sps:$4 sm:$0xff]   ;;  %v819_v22 = vld [vmem:[#allocation5 + $0xa0] ss:$8 sps:$4 sm:$0xff]  }
  0x2e   :  { %v820_v23 = vld [vmem:[#allocation5 + $0xb4] ss:$8 sps:$4 sm:$0xff]   ;;  %v822_v24 = vld [vmem:[#allocation5 + $0xb0] ss:$8 sps:$4 sm:$0xff]   ;;  %v823_v25 = vld [vmem:[#allocation5 + $0xc4] ss:$8 sps:$4 sm:$0xff]  }
  0x2f   :  { %v825_v26 = vld [vmem:[#allocation5 + $0xc0] ss:$8 sps:$4 sm:$0xff]   ;;  %v826_v27 = vld [vmem:[#allocation5 + $0xd4] ss:$8 sps:$4 sm:$0xff]   ;;  %v828_v28 = vld [vmem:[#allocation5 + $0xd0] ss:$8 sps:$4 sm:$0xff]  }
  0x30   :  { %351 = vmatpush1.bf16.msra.mxu0 %v795_v5  ;;  %v829_v29 = vld [vmem:[#allocation5 + $0xe4] ss:$8 sps:$4 sm:$0xff]   ;;  %v831_v30 = vld [vmem:[#allocation5 + $0xe0] ss:$8 sps:$4 sm:$0xff]   ;;  %v832_v31 = vld [vmem:[#allocation5 + $0xf4] ss:$8 sps:$4 sm:$0xff]  }
  0x31   :  { %352 = vmatprep.subr.bf16.mxu0 %v796_v6  ;;  %v834_v32 = vld [vmem:[#allocation5 + $0xf0] ss:$8 sps:$4 sm:$0xff]   ;;  %v835_v33 = vld [vmem:[#allocation2] ss:$8 sps:$4 sm:$0xff]   ;;  %v838_v34 = vld [vmem:[#allocation2 + $0x14] ss:$8 sps:$4 sm:$0xff]  }
  0x32   :  { %v840_v35 = vld [vmem:[#allocation2 + $0x10] ss:$8 sps:$4 sm:$0xff]   ;;  %v841_v36 = vld [vmem:[#allocation2 + $0x24] ss:$8 sps:$4 sm:$0xff]   ;;  %v843_v37 = vld [vmem:[#allocation2 + $0x20] ss:$8 sps:$4 sm:$0xff]  }
  0x33   :  { %v844_v38 = vld [vmem:[#allocation2 + $0x34] ss:$8 sps:$4 sm:$0xff]   ;;  %v846_v39 = vld [vmem:[#allocation2 + $0x30] ss:$8 sps:$4 sm:$0xff]   ;;  %v847_v40 = vld [vmem:[#allocation2 + $0x44] ss:$8 sps:$4 sm:$0xff]  }
  0x34   :  { %353 = vmatpush1.bf16.msra.mxu0 %v798_v7  ;;  %v849_v41 = vld [vmem:[#allocation2 + $0x40] ss:$8 sps:$4 sm:$0xff]   ;;  %v850_v42 = vld [vmem:[#allocation2 + $0x54] ss:$8 sps:$4 sm:$0xff]   ;;  %v852_v43 = vld [vmem:[#allocation2 + $0x50] ss:$8 sps:$4 sm:$0xff]  }
  0x35   :  { %354 = vmatprep.subr.bf16.mxu0 %v799_v8  ;;  %v853_v44 = vld [vmem:[#allocation2 + $0x64] ss:$8 sps:$4 sm:$0xff]   ;;  %v855_v45 = vld [vmem:[#allocation2 + $0x60] ss:$8 sps:$4 sm:$0xff]   ;;  %v856_v46 = vld [vmem:[#allocation2 + $0x74] ss:$8 sps:$4 sm:$0xff]  }
  0x36   :  { %v858_v47 = vld [vmem:[#allocation2 + $0x70] ss:$8 sps:$4 sm:$0xff]   ;;  %v1017_v49 = vshrl.u32 %v96_v48, 7  ;;  %v94_v51 = vld [vmem:[%s1249_s2] sm:$0x3] }
  0x38   :  { %355 = vmatpush1.bf16.msra.mxu0 %v801_v9  ;;  %v98_v50 = vsub.s32 0, %v1017_v49  ;;  %v102_v52 = vsub.s32 1, %v1017_v49 }
  0x39   :  { %356 = vmatprep.subr.bf16.mxu0 %v802_v10 }
  0x3a   :  { %v1026_v53 = vrot.slane %v94_v51, %v98_v50  ;;  %v1030_v54 = vrot.slane %v94_v51, %v102_v52 }
  0x3c   :  { %357 = vmatpush1.bf16.msra.mxu0 %v804_v11 }
  0x3d   :  { %358 = vmatprep.subr.bf16.mxu0 %v805_v12 }
  0x40   :  { %359 = vmatpush1.bf16.msra.mxu0 %v807_v14 }
  0x41   :  { %360 = vmatprep.subr.bf16.mxu0 %v808_v15 }
  0x44   :  { %361 = vmatpush1.bf16.msra.mxu0 %v810_v16 }
  0x45   :  { %362 = vmatprep.subr.bf16.mxu0 %v811_v17 }
  0x48   :  { %363 = vmatpush1.bf16.msra.mxu0 %v813_v18 }
  0x49   :  { %364 = vmatprep.subr.bf16.mxu0 %v814_v19 }
  0x4c   :  { %365 = vmatpush1.bf16.msra.mxu0 %v816_v20 }
  0x4d   :  { %366 = vmatprep.subr.bf16.mxu0 %v817_v21 }
  0x50   :  { %367 = vmatpush1.bf16.msra.mxu0 %v819_v22 }
  0x51   :  { %368 = vmatprep.subr.bf16.mxu0 %v820_v23 }
  0x54   :  { %369 = vmatpush1.bf16.msra.mxu0 %v822_v24 }
  0x55   :  { %370 = vmatprep.subr.bf16.mxu0 %v823_v25 }
  0x58   :  { %371 = vmatpush1.bf16.msra.mxu0 %v825_v26 }
  0x59   :  { %372 = vmatprep.subr.bf16.mxu0 %v826_v27 }
  0x5c   :  { %373 = vmatpush1.bf16.msra.mxu0 %v828_v28 }
  0x5d   :  { %374 = vmatprep.subr.bf16.mxu0 %v829_v29 }
  0x60   :  { %375 = vmatpush1.bf16.msra.mxu0 %v831_v30 }
  0x61   :  { %376 = vmatprep.subr.bf16.mxu0 %v832_v31 }
  0x64   :  { %377 = vmatpush1.bf16.msra.mxu0 %v834_v32 }
  0x67   :  { %379 = vmatmul.mubr.bf16.vlgmr.msra.gmra.mrb[0].mxu0 %v835_v33 }
  0x68   :  { %388 = vmatprep.mubr.bf16.mxu0 %v838_v34 }
  0x6f   :  { %389 = vmatmul.mubr.bf16.gmra.mrb[4].mxu0 %v840_v35 }
  0x70   :  { %398 = vmatprep.mubr.bf16.mxu0 %v841_v36 }
  0x77   :  { %399 = vmatmul.mubr.bf16.gmra.mrb[8].mxu0 %v843_v37 }
  0x78   :  { %408 = vmatprep.mubr.bf16.mxu0 %v844_v38 }
  0x7f   :  { %409 = vmatmul.mubr.bf16.gmra.mrb[12].mxu0 %v846_v39 }
  0x80   :  { %418 = vmatprep.mubr.bf16.mxu0 %v847_v40 }
  0x87   :  { %419 = vmatmul.mubr.bf16.gmra.mrb[16].mxu0 %v849_v41 }
  0x88   :  { %428 = vmatprep.mubr.bf16.mxu0 %v850_v42 }
  0x8f   :  { %429 = vmatmul.mubr.bf16.gmra.mrb[20].mxu0 %v852_v43 }
  0x90   :  { %438 = vmatprep.mubr.bf16.mxu0 %v853_v44 }
  0x97   :  { %439 = vmatmul.mubr.bf16.gmra.mrb[24].mxu0 %v855_v45 }
  0x98   :  { %448 = vmatprep.mubr.bf16.mxu0 %v856_v46 }
  0x9f   :  { %449 = vmatmul.mubr.bf16.gmra.mrb[28].mxu0 %v858_v47 }
 0x13a   :  { %v380_v55 = vpop.f32.mrb[0].mxu0 }
 0x13b   :  { %v1033_v56 = vadd.f32 %v380_v55, %v1026_v53  ;;  %v382_v57 = vpop.f32.mrb[1].mxu0 }
 0x13c   :  { %v1036_v58 = vadd.f32 %v382_v57, %v1030_v54  ;;  %v384_v59 = vpop.f32.mrb[2].mxu0 }
 0x13d   :  { %v1039_v60 = vadd.f32 %v384_v59, %v1026_v53  ;;  %v386_v61 = vpop.f32.mrb[3].mxu0  ;;  %v459_v62 = vmul.f32 %v1033_v56, %v1033_v56 }
 0x13e   :  { %v1044_v63 = vadd.f32 %v386_v61, %v1030_v54  ;;  %v460_v0 = vmul.f32 %v1036_v58, %v1036_v58 }
 0x13f   :  { %v461_v1 = vmul.f32 %v1039_v60, %v1039_v60 }
 0x140   :  { %v462_v2 = vmul.f32 %v1044_v63, %v1044_v63  ;;  %v491_v3 = vadd.f32 %v460_v0, %v459_v62 }
 0x142   :  { %v390_v4 = vpop.f32.mrb[4].mxu0  ;;  %492 = vadd.xlane.f32.xlu0 %v491_v3  ;;  %v494_v9 = vadd.f32 %v462_v2, %v461_v1 }
 0x143   :  { %v1053_v5 = vadd.f32 %v390_v4, %v1026_v53  ;;  %v392_v6 = vpop.f32.mrb[5].mxu0 }
 0x144   :  { %v1056_v7 = vadd.f32 %v392_v6, %v1030_v54  ;;  %v394_v8 = vpop.f32.mrb[6].mxu0 }
 0x145   :  { %v1059_v10 = vadd.f32 %v394_v8, %v1026_v53  ;;  %v396_v11 = vpop.f32.mrb[7].mxu0  ;;  %v463_v12 = vmul.f32 %v1053_v5, %v1053_v5 }
 0x146   :  { %v1064_v13 = vadd.f32 %v396_v11, %v1030_v54  ;;  %495 = vadd.xlane.f32.xlu0 %v494_v9  ;;  %v464_v14 = vmul.f32 %v1056_v7, %v1056_v7 }
 0x147   :  { %v465_v15 = vmul.f32 %v1059_v10, %v1059_v10 }
 0x148   :  { %v466_v16 = vmul.f32 %v1064_v13, %v1064_v13  ;;  %v497_v17 = vadd.f32 %v464_v14, %v463_v12 }
 0x14a   :  { %v400_v18 = vpop.f32.mrb[8].mxu0  ;;  %498 = vadd.xlane.f32.xlu1 %v497_v17  ;;  %v500_v23 = vadd.f32 %v466_v16, %v465_v15 }
 0x14b   :  { %v1073_v19 = vadd.f32 %v400_v18, %v1026_v53  ;;  %v402_v20 = vpop.f32.mrb[9].mxu0 }
 0x14c   :  { %v1076_v21 = vadd.f32 %v402_v20, %v1030_v54  ;;  %v404_v22 = vpop.f32.mrb[10].mxu0 }
 0x14d   :  { %v467_v24 = vmul.f32 %v1073_v19, %v1073_v19  ;;  %v1081_v25 = vadd.f32 %v404_v22, %v1026_v53  ;;  %v406_v26 = vpop.f32.mrb[11].mxu0 }
 0x14e   :  { %v468_v27 = vmul.f32 %v1076_v21, %v1076_v21  ;;  %v1086_v28 = vadd.f32 %v406_v26, %v1030_v54  ;;  %501 = vadd.xlane.f32.xlu1 %v500_v23 }
 0x14f   :  { %v469_v29 = vmul.f32 %v1081_v25, %v1081_v25 }
 0x150   :  { %v470_v30 = vmul.f32 %v1086_v28, %v1086_v28  ;;  %v503_v31 = vadd.f32 %v468_v27, %v467_v24 }
 0x152   :  { %v410_v32 = vpop.f32.mrb[12].mxu0  ;;  %504 = vadd.xlane.f32.xlu0 %v503_v31  ;;  %v506_v33 = vadd.f32 %v470_v30, %v469_v29 }
 0x153   :  { %v1093_v34 = vadd.f32 %v410_v32, %v1026_v53  ;;  %v412_v35 = vpop.f32.mrb[13].mxu0 }
 0x154   :  { %v1096_v36 = vadd.f32 %v412_v35, %v1030_v54  ;;  %v414_v37 = vpop.f32.mrb[14].mxu0  ;;  %507 = vadd.xlane.f32.xlu1 %v506_v33 }
 0x155   :  { %v471_v38 = vmul.f32 %v1093_v34, %v1093_v34  ;;  %v1101_v39 = vadd.f32 %v414_v37, %v1026_v53  ;;  %v416_v40 = vpop.f32.mrb[15].mxu0 }
 0x156   :  { %v472_v41 = vmul.f32 %v1096_v36, %v1096_v36  ;;  %v1106_v42 = vadd.f32 %v416_v40, %v1030_v54 }
 0x157   :  { %v473_v43 = vmul.f32 %v1101_v39, %v1101_v39 }
 0x158   :  { %v474_v44 = vmul.f32 %v1106_v42, %v1106_v42  ;;  %v509_v45 = vadd.f32 %v472_v41, %v471_v38 }
 0x15a   :  { %v420_v46 = vpop.f32.mrb[16].mxu0  ;;  %510 = vadd.xlane.f32.xlu0 %v509_v45  ;;  %v512_v47 = vadd.f32 %v474_v44, %v473_v43 }
 0x15b   :  { %v1113_v48 = vadd.f32 %v420_v46, %v1026_v53  ;;  %v422_v51 = vpop.f32.mrb[17].mxu0 }
 0x15c   :  { %v1116_v55 = vadd.f32 %v422_v51, %v1030_v54  ;;  %v424_v57 = vpop.f32.mrb[18].mxu0  ;;  %513 = vadd.xlane.f32.xlu1 %v512_v47 }
 0x15d   :  { %v475_v59 = vmul.f32 %v1113_v48, %v1113_v48  ;;  %v1121_v61 = vadd.f32 %v424_v57, %v1026_v53  ;;  %v426_v62 = vpop.f32.mrb[19].mxu0 }
 0x15e   :  { %v476_v0 = vmul.f32 %v1116_v55, %v1116_v55  ;;  %v1126_v1 = vadd.f32 %v426_v62, %v1030_v54 }
 0x15f   :  { %v477_v2 = vmul.f32 %v1121_v61, %v1121_v61 }
 0x160   :  { %v478_v3 = vmul.f32 %v1126_v1, %v1126_v1  ;;  %v515_v4 = vadd.f32 %v476_v0, %v475_v59 }
 0x162   :  { %v430_v6 = vpop.f32.mrb[20].mxu0  ;;  %516 = vadd.xlane.f32.xlu0 %v515_v4  ;;  %v518_v8 = vadd.f32 %v478_v3, %v477_v2 }
 0x163   :  { %v1133_v9 = vadd.f32 %v430_v6, %v1026_v53  ;;  %v432_v11 = vpop.f32.mrb[21].mxu0 }
 0x164   :  { %v1136_v12 = vadd.f32 %v432_v11, %v1030_v54  ;;  %v434_v14 = vpop.f32.mrb[22].mxu0  ;;  %519 = vadd.xlane.f32.xlu1 %v518_v8 }
 0x165   :  { %v479_v15 = vmul.f32 %v1133_v9, %v1133_v9  ;;  %v1141_v16 = vadd.f32 %v434_v14, %v1026_v53  ;;  %v436_v17 = vpop.f32.mrb[23].mxu0 }
 0x166   :  { %v480_v18 = vmul.f32 %v1136_v12, %v1136_v12  ;;  %v1146_v20 = vadd.f32 %v436_v17, %v1030_v54 }
 0x167   :  { %v481_v22 = vmul.f32 %v1141_v16, %v1141_v16 }
 0x168   :  { %v482_v23 = vmul.f32 %v1146_v20, %v1146_v20  ;;  %v521_v24 = vadd.f32 %v480_v18, %v479_v15 }
 0x16a   :  { %v440_v26 = vpop.f32.mrb[24].mxu0  ;;  %522 = vadd.xlane.f32.xlu0 %v521_v24  ;;  %v524_v27 = vadd.f32 %v482_v23, %v481_v22 }
 0x16b   :  { %v1153_v29 = vadd.f32 %v440_v26, %v1026_v53  ;;  %v442_v30 = vpop.f32.mrb[25].mxu0 }
 0x16c   :  { %v1156_v31 = vadd.f32 %v442_v30, %v1030_v54  ;;  %v444_v32 = vpop.f32.mrb[26].mxu0  ;;  %525 = vadd.xlane.f32.xlu1 %v524_v27 }
 0x16d   :  { %v483_v33 = vmul.f32 %v1153_v29, %v1153_v29  ;;  %v1161_v35 = vadd.f32 %v444_v32, %v1026_v53  ;;  %v446_v37 = vpop.f32.mrb[27].mxu0 }
 0x16e   :  { %v484_v38 = vmul.f32 %v1156_v31, %v1156_v31  ;;  %v1166_v40 = vadd.f32 %v446_v37, %v1030_v54 }
 0x16f   :  { %v485_v41 = vmul.f32 %v1161_v35, %v1161_v35 }
 0x170   :  { %v486_v43 = vmul.f32 %v1166_v40, %v1166_v40  ;;  %v527_v44 = vadd.f32 %v484_v38, %v483_v33 }
 0x172   :  { %v450_v45 = vpop.f32.mrb[28].mxu0  ;;  %528 = vadd.xlane.f32.xlu0 %v527_v44  ;;  %v530_v46 = vadd.f32 %v486_v43, %v485_v41 }
 0x173   :  { %v1173_v47 = vadd.f32 %v450_v45, %v1026_v53  ;;  %v452_v51 = vpop.f32.mrb[29].mxu0 }
 0x174   :  { %v1176_v57 = vadd.f32 %v452_v51, %v1030_v54  ;;  %v454_v59 = vpop.f32.mrb[30].mxu0  ;;  %531 = vadd.xlane.f32.xlu1 %v530_v46 }
 0x175   :  { %v487_v62 = vmul.f32 %v1173_v47, %v1173_v47  ;;  %v1181_v0 = vadd.f32 %v454_v59, %v1026_v53  ;;  %v456_v2 = vpop.f32.mrb[31].mxu0  ;;  %v1195_v53 = vld [vmem:[%s1250_s3] sm:$0x3]  ;;  %s967_s3 = smov [#allocation7]  }
 0x176   :  { %v488_v3 = vmul.f32 %v1176_v57, %v1176_v57  ;;  %v1186_v4 = vadd.f32 %v456_v2, %v1030_v54  ;;  %v612_v54 = vrot.slane %v1195_v53, %v102_v52  ;;  %s692_s16 = sshll.u32 %s967_s3, 4  ;;  %s693_s16 = int_to_ptr.vmem [resolvable:$true] %s692_s16 }
 0x177   :  { %v489_v6 = vmul.f32 %v1181_v0, %v1181_v0  ;;  %s935_s17 = scalar_lea.vmem %s693_s16, 16  ;;  %s939_s18 = scalar_lea.vmem %s693_s16, 32 }
 0x178   :  { %v490_v8 = vmul.f32 %v1186_v4, %v1186_v4  ;;  %v533_v11 = vadd.f32 %v488_v3, %v487_v62  ;;  %679 = vmatprep.mubr.f32.mxu1 %v612_v54  ;;  %p936_p2 = scmp.ne.s32.totalorder %s693_s16, %s935_s17  ;;  %p940_p3 = scmp.lt.s32.totalorder %s693_s16, %s693_s16 }
 0x179   :  { %p941_p4 = scmp.lt.s32.totalorder %s939_s18, %s935_s17 }
 0x17a   :  { %534 = vadd.xlane.f32.xlu0 %v533_v11  ;;  %v536_v14 = vadd.f32 %v490_v8, %v489_v6 }
 0x17b   :  { %p942_p5 = por %p941_p4, %p940_p3 }
 0x17c   :  { %537 = vadd.xlane.f32.xlu1 %v536_v14 }
 0x17d   :  { %p943_p6 = pnand %p942_p5, %p936_p2 }
 0x1cf   :  { %v493_v15 = vpop.xlane.xlu0 %492 }
 0x1d0   :  { %v539_v17 = vmax.f32 %v493_v15, 1e-24 }
 0x1d2   :  { %859 = vrsqrt.f32 %v539_v17 }
 0x1d3   :  { %v496_v18 = vpop.xlane.xlu0 %495 }
 0x1d4   :  { %v540_v22 = vmax.f32 %v496_v18, 1e-24 }
 0x1d6   :  { %861 = vrsqrt.f32 %v540_v22 }
 0x1d7   :  { %v499_v23 = vpop.xlane.xlu1 %498 }
 0x1d8   :  { %v541_v24 = vmax.f32 %v499_v23, 1e-24 }
 0x1da   :  { %863 = vrsqrt.f32 %v541_v24 }
 0x1db   :  { %v502_v26 = vpop.xlane.xlu1 %501 }
 0x1dc   :  { %v542_v27 = vmax.f32 %v502_v26, 1e-24  ;;  %v860_v30 = vpop.eup %859 }
 0x1dd   :  { %v572_v52 = vmul.f32 %v860_v30, %v1036_v58  ;;  %v571_v43 = vmul.f32 %v860_v30, %v1033_v56 }
 0x1de   :  { %865 = vrsqrt.f32 %v542_v27 }
 0x1df   :  { %v505_v32 = vpop.xlane.xlu0 %504 }
 0x1e0   :  { %v862_v33 = vpop.eup %861  ;;  %v543_v37 = vmax.f32 %v505_v32, 1e-24 }
 0x1e1   :  { %v508_v38 = vpop.xlane.xlu1 %507  ;;  %v574_v41 = vmul.f32 %v862_v33, %v1044_v63  ;;  %v573_v44 = vmul.f32 %v862_v33, %v1039_v60 }
 0x1e2   :  { %867 = vrsqrt.f32 %v543_v37  ;;  %v544_v45 = vmax.f32 %v508_v38, 1e-24 }
 0x1e3   :  { %v750_v46 = vpack.c.bf16 %v574_v41, %v572_v52  ;;  %v752_v51 = vpack.c.bf16 %v573_v44, %v571_v43 }
 0x1e4   :  { %869 = vrsqrt.f32 %v544_v45  ;;  %v864_v59 = vpop.eup %863 }
 0x1e5   :  { %751 = vmatprep.subr.bf16.mxu1 %v750_v46  ;;  %v576_v58 = vmul.f32 %v864_v59, %v1056_v7  ;;  %v575_v56 = vmul.f32 %v864_v59, %v1053_v5 }
 0x1e6   :  { %753 = vmatpush1.bf16.xpose.msra.mxu1 %v752_v51 }
 0x1e7   :  { %v511_v62 = vpop.xlane.xlu0 %510 }
 0x1e8   :  { %v866_v2 = vpop.eup %865  ;;  %v545_v3 = vmax.f32 %v511_v62, 1e-24 }
 0x1e9   :  { %v514_v6 = vpop.xlane.xlu1 %513  ;;  %v578_v63 = vmul.f32 %v866_v2, %v1064_v13  ;;  %v577_v60 = vmul.f32 %v866_v2, %v1059_v10 }
 0x1ea   :  { %871 = vrsqrt.f32 %v545_v3  ;;  %v546_v8 = vmax.f32 %v514_v6, 1e-24 }
 0x1eb   :  { %v754_v11 = vpack.c.bf16 %v578_v63, %v576_v58  ;;  %v756_v14 = vpack.c.bf16 %v577_v60, %v575_v56 }
 0x1ec   :  { %v868_v54 = vpop.eup %867  ;;  %873 = vrsqrt.f32 %v546_v8 }
 0x1ed   :  { %755 = vmatprep.subr.bf16.mxu1 %v754_v11  ;;  %v580_v18 = vmul.f32 %v868_v54, %v1076_v21  ;;  %v579_v24 = vmul.f32 %v868_v54, %v1073_v19 }
 0x1ee   :  { %v870_v15 = vpop.eup %869  ;;  %757 = vmatpush1.bf16.xpose.msra.mxu1 %v756_v14 }
 0x1ef   :  { %v517_v17 = vpop.xlane.xlu0 %516  ;;  %v582_v7 = vmul.f32 %v870_v15, %v1086_v28  ;;  %v581_v13 = vmul.f32 %v870_v15, %v1081_v25 }
 0x1f0   :  { %v547_v22 = vmax.f32 %v517_v17, 1e-24 }
 0x1f1   :  { %v520_v5 = vpop.xlane.xlu1 %519  ;;  %v758_v23 = vpack.c.bf16 %v582_v7, %v580_v18  ;;  %v760_v27 = vpack.c.bf16 %v581_v13, %v579_v24 }
 0x1f2   :  { %875 = vrsqrt.f32 %v547_v22  ;;  %v548_v10 = vmax.f32 %v520_v5, 1e-24 }
 0x1f3   :  { %759 = vmatprep.subr.bf16.mxu1 %v758_v23 }
 0x1f4   :  { %v872_v26 = vpop.eup %871  ;;  %877 = vrsqrt.f32 %v548_v10 }
 0x1f5   :  { %v584_v21 = vmul.f32 %v872_v26, %v1096_v36  ;;  %v583_v19 = vmul.f32 %v872_v26, %v1093_v34 }
 0x1f6   :  { %v874_v30 = vpop.eup %873  ;;  %761 = vmatpush1.bf16.xpose.msra.mxu1 %v760_v27 }
 0x1f7   :  { %v523_v32 = vpop.xlane.xlu0 %522  ;;  %v586_v28 = vmul.f32 %v874_v30, %v1106_v42  ;;  %v585_v25 = vmul.f32 %v874_v30, %v1101_v39 }
 0x1f8   :  { %v549_v33 = vmax.f32 %v523_v32, 1e-24 }
 0x1f9   :  { %v526_v37 = vpop.xlane.xlu1 %525  ;;  %v762_v38 = vpack.c.bf16 %v586_v28, %v584_v21  ;;  %v764_v43 = vpack.c.bf16 %v585_v25, %v583_v19 }
 0x1fa   :  { %879 = vrsqrt.f32 %v549_v33  ;;  %v550_v52 = vmax.f32 %v526_v37, 1e-24 }
 0x1fb   :  { %763 = vmatprep.subr.bf16.mxu1 %v762_v38 }
 0x1fc   :  { %v876_v41 = vpop.eup %875  ;;  %881 = vrsqrt.f32 %v550_v52 }
 0x1fd   :  { %v588_v36 = vmul.f32 %v876_v41, %v1116_v55  ;;  %v587_v34 = vmul.f32 %v876_v41, %v1113_v48 }
 0x1fe   :  { %v878_v44 = vpop.eup %877  ;;  %765 = vmatpush1.bf16.xpose.msra.mxu1 %v764_v43 }
 0x1ff   :  { %v529_v45 = vpop.xlane.xlu0 %528  ;;  %v590_v42 = vmul.f32 %v878_v44, %v1126_v1  ;;  %v589_v39 = vmul.f32 %v878_v44, %v1121_v61 }
 0x200   :  { %v551_v46 = vmax.f32 %v529_v45, 1e-24 }
 0x201   :  { %v532_v51 = vpop.xlane.xlu1 %531  ;;  %v766_v59 = vpack.c.bf16 %v590_v42, %v588_v36  ;;  %v768_v3 = vpack.c.bf16 %v589_v39, %v587_v34 }
 0x202   :  { %883 = vrsqrt.f32 %v551_v46  ;;  %v552_v62 = vmax.f32 %v532_v51, 1e-24 }
 0x203   :  { %767 = vmatprep.subr.bf16.mxu1 %v766_v59 }
 0x204   :  { %v880_v2 = vpop.eup %879  ;;  %885 = vrsqrt.f32 %v552_v62 }
 0x205   :  { %v592_v55 = vmul.f32 %v880_v2, %v1136_v12  ;;  %v591_v48 = vmul.f32 %v880_v2, %v1133_v9 }
 0x206   :  { %v882_v6 = vpop.eup %881  ;;  %769 = vmatpush1.bf16.xpose.msra.mxu1 %v768_v3 }
 0x207   :  { %v535_v58 = vpop.xlane.xlu0 %534  ;;  %v594_v1 = vmul.f32 %v882_v6, %v1146_v20  ;;  %v593_v61 = vmul.f32 %v882_v6, %v1141_v16 }
 0x208   :  { %v553_v63 = vmax.f32 %v535_v58, 1e-24 }
 0x209   :  { %v538_v56 = vpop.xlane.xlu1 %537  ;;  %v770_v60 = vpack.c.bf16 %v594_v1, %v592_v55  ;;  %v772_v14 = vpack.c.bf16 %v593_v61, %v591_v48 }
 0x20a   :  { %887 = vrsqrt.f32 %v553_v63  ;;  %v554_v8 = vmax.f32 %v538_v56, 1e-24 }
 0x20b   :  { %771 = vmatprep.subr.bf16.mxu1 %v770_v60 }
 0x20c   :  { %v884_v11 = vpop.eup %883  ;;  %889 = vrsqrt.f32 %v554_v8 }
 0x20d   :  { %v596_v15 = vmul.f32 %v884_v11, %v1156_v31  ;;  %v595_v16 = vmul.f32 %v884_v11, %v1153_v29  ;;  %v608_v29 = vrot.slane %v1195_v53, %v98_v50 }
 0x20e   :  { %v886_v54 = vpop.eup %885  ;;  %773 = vmatpush1.bf16.xpose.msra.mxu1 %v772_v14 }
 0x20f   :  { %v598_v12 = vmul.f32 %v886_v54, %v1166_v40  ;;  %v597_v20 = vmul.f32 %v886_v54, %v1161_v35 }
 0x211   :  { %v774_v17 = vpack.c.bf16 %v598_v12, %v596_v15  ;;  %v776_v7 = vpack.c.bf16 %v597_v20, %v595_v16 }
 0x213   :  { %775 = vmatprep.subr.bf16.mxu1 %v774_v17 }
 0x214   :  { %v888_v18 = vpop.eup %887 }
 0x215   :  { %v600_v9 = vmul.f32 %v888_v18, %v1176_v57  ;;  %v599_v31 = vmul.f32 %v888_v18, %v1173_v47 }
 0x216   :  { %v890_v22 = vpop.eup %889  ;;  %777 = vmatpush1.bf16.xpose.msra.mxu1 %v776_v7 }
 0x217   :  { %v602_v13 = vmul.f32 %v890_v22, %v1186_v4  ;;  %v601_v5 = vmul.f32 %v890_v22, %v1181_v0 }
 0x219   :  { %v778_v23 = vpack.c.bf16 %v602_v13, %v600_v9  ;;  %v780_v40 = vpack.c.bf16 %v601_v5, %v599_v31 }
 0x21b   :  { %779 = vmatprep.subr.bf16.mxu1 %v778_v23 }
 0x21e   :  { %781 = vmatpush1.bf16.xpose.msra.mxu1 %v780_v40 }
 0x225   :  { %680 = vmatmul.mubr.f32.vlgmr.msra.gmra.mrb[0].mxu1 %v608_v29 }
 0x2f8   :  { %v681_v35 = vpop.f32.mrb[0].mxu1 }
 0x2f9   :  { %685 = vst [vmem:[#allocation7] sm:$0x1] %v681_v35  ;;  %v683_v57 = vpop.f32.mrb[1].mxu1 }
 0x2fa   :  { %946 = shalt.err (!%p943_p6)
}
 0x2fb   :  { %s947_s21 = scalar_lea.hbm %s1251_s4, 16 }
 0x2fc   :  { %p948_p7 = scmp.ne.s32.totalorder %s1251_s4, %s947_s21  ;;  %p951_p8 = scmp.lt.u32.totalorder %s947_s21, %s1251_s4 }
 0x2fe   :  { %p953_p9 = pnand %p951_p8, %p948_p7 }
 0x300   :  { %956 = shalt.err (!%p953_p9)
}
 0x301   :  { %695 = dma.vmem_to_hbm [thread:$0]  %s693_s16, 16, %s1251_s4, [#allocation4]  }
 0x302   :  { %961 = dma.done.wait [#allocation4], 16  }
 0x303   :  { %962 = vsyncadd [#allocation4], 4294967280 }
 0x304   :  { %699 = vsyncpa [#allocation3], 1 }
 0x305   :  { %700 = vsyncpa [#allocation6], 1 }
 0x306   :  { %701 = vsyncpa [#allocation4], 1 }

</bundles_post_ra>
